<compile_context>
chip_gen: v7x
topology: tpu7x:2x2x1
jax: 0.10.0
libtpu: 0.0.40
codegen_flags: <defaults>
</compile_context>

<pallas_src>
from functools import partial

import jax
import jax.numpy as jnp
from jax.experimental import pallas as pl
from jax.experimental.pallas import tpu as pltpu

LANE = 128
DEFAULT_TILE_B = 512  # sweep 512/1024/2048 for very large batches


def mlp_kernel(x_ref, w1_ref, c1_ref, w2_ref, c2_ref, w3t_ref, c3_ref, ot_ref):
    # Layer 1: (Linear + folded BN) -> tanh.  x cast in-kernel (VPU, free).
    x = x_ref[...].astype(w1_ref.dtype)
    h = jnp.tanh(
        jnp.dot(x, w1_ref[...], preferred_element_type=jnp.float32)
        + c1_ref[...])

    # Layer 2: (Linear + folded BN) -> tanh -> Dropout (eval: identity).
    h = jnp.tanh(
        jnp.dot(h.astype(w2_ref.dtype), w2_ref[...],
                preferred_element_type=jnp.float32)
        + c2_ref[...])

    # Output layer, computed transposed so the HBM store is lane-dense:
    #   y^T = W3^T @ h^T + c3   with (Op, H1p) @ (H1p, tile_b) -> (Op, tile_b)
    ht = h.T  # f32 (tile_b,128)->(128,tile_b): well-shaped XLU transpose
    yt = jnp.dot(w3t_ref[...], ht.astype(w3t_ref.dtype),
                 preferred_element_type=jnp.float32)
    ot_ref[...] = (yt + c3_ref[...]).astype(ot_ref.dtype)


def make_params(key, input_size, hidden_sizes, output_size):
    """Deterministic synthetic parameters (PyTorch-like shapes/init)."""
    keys = jax.random.split(key, 16)
    ki = iter(range(16))

    def linear(kw, kb, fan_in, fan_out):
        bound = 1.0 / jnp.sqrt(fan_in)
        w = jax.random.uniform(kw, (fan_in, fan_out), jnp.float32, -bound, bound)
        b = jax.random.uniform(kb, (fan_out,), jnp.float32, -bound, bound)
        return w, b

    def bn(kg, kb, km, kv, n):
        gamma = 1.0 + 0.1 * jax.random.normal(kg, (n,), jnp.float32)
        beta = 0.1 * jax.random.normal(kb, (n,), jnp.float32)
        mean = 0.1 * jax.random.normal(km, (n,), jnp.float32)
        var = 1.0 + 0.1 * jnp.abs(jax.random.normal(kv, (n,), jnp.float32))
        return gamma, beta, mean, var

    h0, h1 = hidden_sizes
    w1, b1 = linear(keys[next(ki)], keys[next(ki)], input_size, h0)
    bn1 = bn(keys[next(ki)], keys[next(ki)], keys[next(ki)], keys[next(ki)], h0)
    w2, b2 = linear(keys[next(ki)], keys[next(ki)], h0, h1)
    bn2 = bn(keys[next(ki)], keys[next(ki)], keys[next(ki)], keys[next(ki)], h1)
    w3, b3 = linear(keys[next(ki)], keys[next(ki)], h1, output_size)
    return (w1, b1, bn1, w2, b2, bn2, w3, b3)


def fold_bn(gamma, beta, mean, var, eps=1e-5):
    """y = (x - mean)/sqrt(var+eps)*gamma + beta  ->  x*scale + shift."""
    scale = gamma / jnp.sqrt(var + eps)
    shift = beta - mean * scale
    return scale, shift


def _round_up(n, m):
    return ((n + m - 1) // m) * m


def prepare_params(params, use_bf16=False):
    """One-time static prep: fold BN, pad lane dims, pre-transpose W3, cast.

    Run once (not per call) — the review flagged re-running this per call.
    """
    (w1, b1, (g1, be1, m1, v1),
     w2, b2, (g2, be2, m2, v2),
     w3, b3) = params

    # (x @ w + b) * s + t  ==  x @ (w * s) + (b * s + t)
    s1, t1 = fold_bn(g1, be1, m1, v1)
    s2, t2 = fold_bn(g2, be2, m2, v2)
    w1f, c1 = w1 * s1[None, :], b1 * s1 + t1
    w2f, c2 = w2 * s2[None, :], b2 * s2 + t2

    F, H0 = w1.shape
    H1 = w2.shape[1]
    O = w3.shape[1]
    H0p, H1p = _round_up(H0, LANE), _round_up(H1, LANE)
    Op = _round_up(O, 8)  # sublane-align the (small) transposed output dim

    wdt = jnp.bfloat16 if use_bf16 else jnp.float32

    # Padded columns/rows are zero; tanh(0)=0, so padding never contaminates.
    w1p = jnp.pad(w1f, ((0, 0), (0, H0p - H0))).astype(wdt)        # (F,   H0p)
    c1p = jnp.pad(c1, (0, H0p - H0)).reshape(1, H0p)               # f32
    w2p = jnp.pad(w2f, ((0, H0p - H0), (0, H1p - H1))).astype(wdt)  # (H0p, H1p)
    c2p = jnp.pad(c2, (0, H1p - H1)).reshape(1, H1p)               # f32
    w3tp = jnp.pad(w3.T, ((0, Op - O), (0, H1p - H1))).astype(wdt)  # (Op, H1p)
    c3p = jnp.pad(b3, (0, Op - O)).reshape(Op, 1)                  # f32 column
    return (w1p, c1p, w2p, c2p, w3tp, c3p)


@partial(jax.jit, static_argnames=("out_features", "tile_b"))
def mlp_forward(x, prep, *, out_features, tile_b=DEFAULT_TILE_B):
    """Per-call path: pad batch, fused pallas_call, tiny slice/transpose."""
    w1p, c1p, w2p, c2p, w3tp, c3p = prep
    B, F = x.shape
    H0p = w1p.shape[1]
    H1p = w2p.shape[1]
    Op = w3tp.shape[0]

    # Batch tile: >=128 (well-shaped transpose/stores), <= padded batch.
    # With the default 512 and realistic B the grid stays >=2 so the
    # "parallel" axis can shard across v7x's two TensorCores.
    tb = max(128, min(tile_b, _round_up(max(B, 1), 128)))
    Bp = _round_up(B, tb)
    xp = jnp.pad(x, ((0, Bp - B), (0, 0)))  # batch pad only; features untouched

    grid = (Bp // tb,)
    const = lambda i: (0, 0)  # weights/biases stay VMEM-resident across tiles

    wbytes = sum(int(a.size) * a.dtype.itemsize
                 for a in (w1p, c1p, w2p, c2p, w3tp, c3p))
    cost = pl.CostEstimate(
        flops=2 * Bp * (F * H0p + H0p * H1p + H1p * Op),
        transcendentals=Bp * (H0p + H1p),
        bytes_accessed=int(xp.size) * xp.dtype.itemsize + wbytes + Op * Bp * 4,
    )

    out_t = pl.pallas_call(
        mlp_kernel,
        out_shape=jax.ShapeDtypeStruct((Op, Bp), jnp.float32),
        grid=grid,
        in_specs=[
            pl.BlockSpec((tb, F), lambda i: (i, 0)),  # x: batch-tiled, K=16 unpadded
            pl.BlockSpec((F, H0p), const),            # W1' (BN-folded)
            pl.BlockSpec((1, H0p), const),            # c1
            pl.BlockSpec((H0p, H1p), const),          # W2' (BN-folded)
            pl.BlockSpec((1, H1p), const),            # c2
            pl.BlockSpec((Op, H1p), const),           # W3^T
            pl.BlockSpec((Op, 1), const),             # c3 (column)
        ],
        out_specs=pl.BlockSpec((Op, tb), lambda i: (0, i)),  # lane-dense writes
        compiler_params=pltpu.CompilerParams(
            dimension_semantics=("parallel",),
            vmem_limit_bytes=32 * 1024 * 1024,
        ),
        cost_estimate=cost,
    )(xp, w1p, c1p, w2p, c2p, w3tp, c3p)

    # (Op, Bp) -> (B, O): tiny slice + transpose on an (Op, B) array.
    return out_t[:out_features, :B].T


def mlp_reference(x, params):
    """Plain-JAX reference of the eval-mode forward pass."""
    (w1, b1, (g1, be1, m1, v1),
     w2, b2, (g2, be2, m2, v2),
     w3, b3) = params
    s1, t1 = fold_bn(g1, be1, m1, v1)
    s2, t2 = fold_bn(g2, be2, m2, v2)
    h = jnp.tanh((x @ w1 + b1) * s1 + t1)
    h = jnp.tanh((h @ w2 + b2) * s2 + t2)
    return h @ w3 + b3


if __name__ == "__main__":
    input_size = 16
    hidden_sizes = [32, 32]
    output_size = 4
    batch = 8

    key = jax.random.PRNGKey(0)
    kx, kp = jax.random.split(key)
    x = jax.random.normal(kx, (batch, input_size), jnp.float32)
    params = make_params(kp, input_size, hidden_sizes, output_size)

    ref = mlp_reference(x, params)

    # f32 path: strict check.
    prep_f32 = prepare_params(params, use_bf16=False)
    out = mlp_forward(x, prep_f32, out_features=output_size)
    jax.block_until_ready(out)
    assert out.shape == (batch, output_size)
    assert jnp.allclose(out, ref, atol=1e-5, rtol=1e-5), "f32 path mismatch"

    # bf16-weights path (recommended default on v6e/v7x): looser tolerance.
    prep_bf16 = prepare_params(params, use_bf16=True)
    out_bf16 = mlp_forward(x, prep_bf16, out_features=output_size)
    jax.block_until_ready(out_bf16)
    assert out_bf16.shape == (batch, output_size)
    assert jnp.allclose(out_bf16, ref, atol=5e-2, rtol=5e-2), "bf16 path mismatch"

    print("KERNEL_OK")
</pallas_src>

<mosaic_0001>
module attributes {stable_mosaic.version = 11 : i64} {
  func.func @mlp_kernel(%arg0: i32, %arg1: memref<128x16xf32, #tpu.memory_space<vmem>>, %arg2: memref<16x128xf32, #tpu.memory_space<vmem>>, %arg3: memref<1x128xf32, #tpu.memory_space<vmem>>, %arg4: memref<128x128xf32, #tpu.memory_space<vmem>>, %arg5: memref<1x128xf32, #tpu.memory_space<vmem>>, %arg6: memref<8x128xf32, #tpu.memory_space<vmem>>, %arg7: memref<8x1xf32, #tpu.memory_space<vmem>>, %arg8: memref<8x128xf32, #tpu.memory_space<vmem>>) attributes {dimension_semantics = [#tpu.dimension_semantics<parallel>], iteration_bounds = array<i64: 1>, scalar_prefetch = 0 : i64, scratch_operands = 0 : i64, tpu.core_type = #tpu.core_type<tc>, window_params = [{transform_indices = @transform_0, window_bounds = array<i64: 128, 16>}, {pipeline_mode = #tpu.pipeline_mode<synchronous>, transform_indices = @transform_1, window_bounds = array<i64: 16, 128>}, {pipeline_mode = #tpu.pipeline_mode<synchronous>, transform_indices = @transform_2, window_bounds = array<i64: 1, 128>}, {pipeline_mode = #tpu.pipeline_mode<synchronous>, transform_indices = @transform_3, window_bounds = array<i64: 128, 128>}, {pipeline_mode = #tpu.pipeline_mode<synchronous>, transform_indices = @transform_4, window_bounds = array<i64: 1, 128>}, {pipeline_mode = #tpu.pipeline_mode<synchronous>, transform_indices = @transform_5, window_bounds = array<i64: 8, 128>}, {pipeline_mode = #tpu.pipeline_mode<synchronous>, transform_indices = @transform_6, window_bounds = array<i64: 8, 1>}, {transform_indices = @transform_7, window_bounds = array<i64: 8, 128>}]} {
    %c0 = arith.constant 0 : index
    %c0_0 = arith.constant 0 : index
    %0 = vector.load %arg1[%c0, %c0_0] : memref<128x16xf32, #tpu.memory_space<vmem>>, vector<128x16xf32>
    %c0_1 = arith.constant 0 : index
    %c0_2 = arith.constant 0 : index
    %1 = vector.load %arg2[%c0_1, %c0_2] : memref<16x128xf32, #tpu.memory_space<vmem>>, vector<16x128xf32>
    %cst = arith.constant dense<0.000000e+00> : vector<128x128xf32>
    %2 = tpu.matmul %0, %1, %cst {dimension_numbers = #tpu.dot_dimension_numbers<[1], [0], [0], [1], [0, 0, 1, 1], [], []>} : vector<128x16xf32>, vector<16x128xf32>, vector<128x128xf32> -> vector<128x128xf32>
    %c0_3 = arith.constant 0 : index
    %c0_4 = arith.constant 0 : index
    %3 = vector.load %arg3[%c0_3, %c0_4] : memref<1x128xf32, #tpu.memory_space<vmem>>, vector<1x128xf32>
    %4 = vector.broadcast %3 : vector<1x128xf32> to vector<128x128xf32>
    %5 = arith.addf %2, %4 : vector<128x128xf32>
    %6 = math.tanh %5 : vector<128x128xf32>
    %c0_5 = arith.constant 0 : index
    %c0_6 = arith.constant 0 : index
    %7 = vector.load %arg4[%c0_5, %c0_6] : memref<128x128xf32, #tpu.memory_space<vmem>>, vector<128x128xf32>
    %cst_7 = arith.constant dense<0.000000e+00> : vector<128x128xf32>
    %8 = tpu.matmul %6, %7, %cst_7 {dimension_numbers = #tpu.dot_dimension_numbers<[1], [0], [0], [1], [0, 0, 1, 1], [], []>} : vector<128x128xf32>, vector<128x128xf32>, vector<128x128xf32> -> vector<128x128xf32>
    %c0_8 = arith.constant 0 : index
    %c0_9 = arith.constant 0 : index
    %9 = vector.load %arg5[%c0_8, %c0_9] : memref<1x128xf32, #tpu.memory_space<vmem>>, vector<1x128xf32>
    %10 = vector.broadcast %9 : vector<1x128xf32> to vector<128x128xf32>
    %11 = arith.addf %8, %10 : vector<128x128xf32>
    %12 = math.tanh %11 : vector<128x128xf32>
    %13 = tpu.transpose %12, [1, 0] : vector<128x128xf32> -> vector<128x128xf32>
    %c0_10 = arith.constant 0 : index
    %c0_11 = arith.constant 0 : index
    %14 = vector.load %arg6[%c0_10, %c0_11] : memref<8x128xf32, #tpu.memory_space<vmem>>, vector<8x128xf32>
    %cst_12 = arith.constant dense<0.000000e+00> : vector<8x128xf32>
    %15 = tpu.matmul %14, %13, %cst_12 {dimension_numbers = #tpu.dot_dimension_numbers<[1], [0], [0], [1], [0, 0, 1, 1], [], []>} : vector<8x128xf32>, vector<128x128xf32>, vector<8x128xf32> -> vector<8x128xf32>
    %c0_13 = arith.constant 0 : index
    %c0_14 = arith.constant 0 : index
    %16 = vector.load %arg7[%c0_13, %c0_14] : memref<8x1xf32, #tpu.memory_space<vmem>>, vector<8x1xf32>
    %17 = vector.broadcast %16 : vector<8x1xf32> to vector<8x128xf32>
    %18 = arith.addf %15, %17 : vector<8x128xf32>
    %c0_15 = arith.constant 0 : index
    %c0_16 = arith.constant 0 : index
    %19 = vector.load %arg8[%c0_15, %c0_16] : memref<8x128xf32, #tpu.memory_space<vmem>>, vector<8x128xf32>
    tpu.vector_store %arg8[%c0_15, %c0_16], %18 {strides = array<i32>} : memref<8x128xf32, #tpu.memory_space<vmem>>, vector<8x128xf32>,
    return
  }
  func.func @transform_0(%arg0: i32) -> (i32, i32) {
    %c0_i32 = arith.constant 0 : i32
    %c0_i32_0 = arith.constant 0 : i32
    return %arg0, %c0_i32 : i32, i32
  }
  func.func @transform_1(%arg0: i32) -> (i32, i32) {
    %c0_i32 = arith.constant 0 : i32
    %c0_i32_0 = arith.constant 0 : i32
    %c0_i32_1 = arith.constant 0 : i32
    return %c0_i32, %c0_i32_0 : i32, i32
  }
  func.func @transform_2(%arg0: i32) -> (i32, i32) {
    %c0_i32 = arith.constant 0 : i32
    %c0_i32_0 = arith.constant 0 : i32
    %c0_i32_1 = arith.constant 0 : i32
    return %c0_i32, %c0_i32_0 : i32, i32
  }
  func.func @transform_3(%arg0: i32) -> (i32, i32) {
    %c0_i32 = arith.constant 0 : i32
    %c0_i32_0 = arith.constant 0 : i32
    %c0_i32_1 = arith.constant 0 : i32
    return %c0_i32, %c0_i32_0 : i32, i32
  }
  func.func @transform_4(%arg0: i32) -> (i32, i32) {
    %c0_i32 = arith.constant 0 : i32
    %c0_i32_0 = arith.constant 0 : i32
    %c0_i32_1 = arith.constant 0 : i32
    return %c0_i32, %c0_i32_0 : i32, i32
  }
  func.func @transform_5(%arg0: i32) -> (i32, i32) {
    %c0_i32 = arith.constant 0 : i32
    %c0_i32_0 = arith.constant 0 : i32
    %c0_i32_1 = arith.constant 0 : i32
    return %c0_i32, %c0_i32_0 : i32, i32
  }
  func.func @transform_6(%arg0: i32) -> (i32, i32) {
    %c0_i32 = arith.constant 0 : i32
    %c0_i32_0 = arith.constant 0 : i32
    %c0_i32_1 = arith.constant 0 : i32
    return %c0_i32, %c0_i32_0 : i32, i32
  }
  func.func @transform_7(%arg0: i32) -> (i32, i32) {
    %c0_i32 = arith.constant 0 : i32
    %c0_i32_0 = arith.constant 0 : i32
    return %c0_i32, %arg0 : i32, i32
  }
}

</mosaic_0001>

<bundles_post_ra>
// kernel: mlp_forward.1
= control target key start
LH: loop header
LB: loop body
LE: loop exit
PB: predicated region body
PF: predicated region fallthrough
CT: control target
= control target key end

     0   :  { %vm51_vm0 = vcmask 130048   ;;  %vm861_vm1 = vmmov 0   ;;  %s1081_s1 = inlined_call_operand.vmem [shape: f32[16,128], index: 1, kind: input, shape index: {}]   ;;  %s1082_s0 = inlined_call_operand.vmem [shape: f32[128,16], index: 0, kind: input, shape index: {}]   ;;  %s1083_s3 = inlined_call_operand.vmem [shape: f32[128,128], index: 3, kind: input, shape index: {}]   ;;  %s1084_s2 = inlined_call_operand.vmem [shape: f32[1,128], index: 2, kind: input, shape index: {}]   ;;  %s1085_s6 = inlined_call_operand.vmem [shape: f32[8,1], index: 6, kind: input, shape index: {}]   ;;  %s1086_s4 = inlined_call_operand.vmem [shape: f32[1,128], index: 4, kind: input, shape index: {}]   ;;  %s1087_s5 = inlined_call_operand.vmem [shape: f32[8,128], index: 5, kind: input, shape index: {}]   ;;  %s1088_s7 = inlined_call_operand.vmem [shape: f32[8,128], index: 7, kind: output, shape index: {}]  }
   0x1   :  { %v42_v0 = vld [vmem:[%s1081_s1] sm:$0xff]  ;;  %v43_v1 = vld [vmem:[%s1081_s1 + $0x8] sm:$0xff]  ;;  %v28_v5 = vld [vmem:[%s1082_s0 + $0x10] sm:$0xff] }
   0x2   :  { %v26_v2 = vld [vmem:[%s1082_s0] sm:$0xff]  ;;  %v731_v3 = vpack.c.bf16 %v43_v1, %v42_v0  ;;  %v27_v4 = vld [vmem:[%s1082_s0 + $0x8] sm:$0xff]  ;;  %v263_v8 = vld [vmem:[%s1083_s3 + $0x10] sm:$0xff] }
   0x3   :  { %616 = vmatprep.mubr.msk.f32.mxu1 %vm51_vm0, %v26_v2  ;;  %v261_v6 = vld [vmem:[%s1083_s3] sm:$0xff]  ;;  %v262_v7 = vld [vmem:[%s1083_s3 + $0x8] sm:$0xff]  ;;  %v264_v10 = vld [vmem:[%s1083_s3 + $0x18] sm:$0xff] }
   0x4   :  { %732 = vmatprep.subr.bf16.mxu1 %v731_v3  ;;  %v735_v9 = vpack.c.bf16 %v262_v7, %v261_v6  ;;  %v29_v11 = vld [vmem:[%s1082_s0 + $0x18] sm:$0xff]  ;;  %v739_v12 = vpack.c.bf16 %v264_v10, %v263_v8  ;;  %v265_v13 = vld [vmem:[%s1083_s3 + $0x20] sm:$0xff]  ;;  %v266_v14 = vld [vmem:[%s1083_s3 + $0x28] sm:$0xff] }
   0x5   :  { %734 = vmatpush3.bf16.msra.mxu1 %v731_v3  ;;  %v30_v15 = vld [vmem:[%s1082_s0 + $0x20] sm:$0xff]  ;;  %v743_v16 = vpack.c.bf16 %v266_v14, %v265_v13  ;;  %v31_v17 = vld [vmem:[%s1082_s0 + $0x28] sm:$0xff]  ;;  %v267_v18 = vld [vmem:[%s1083_s3 + $0x30] sm:$0xff] }
   0x6   :  { %736 = vmatprep.subr.bf16.mxu1 %v735_v9  ;;  %v268_v19 = vld [vmem:[%s1083_s3 + $0x38] sm:$0xff]  ;;  %v32_v20 = vld [vmem:[%s1082_s0 + $0x30] sm:$0xff]  ;;  %v269_v23 = vld [vmem:[%s1083_s3 + $0x40] sm:$0xff] }
   0x7   :  { %v747_v21 = vpack.c.bf16 %v268_v19, %v267_v18  ;;  %v33_v22 = vld [vmem:[%s1082_s0 + $0x38] sm:$0xff]  ;;  %v270_v24 = vld [vmem:[%s1083_s3 + $0x48] sm:$0xff]  ;;  %v34_v25 = vld [vmem:[%s1082_s0 + $0x40] sm:$0xff] }
   0x8   :  { %617 = vmatmul.mubr.msk.f32.vlgmr.msra.gmra.mrb[0].mxu1 %vm51_vm0, %v27_v4  ;;  %v751_v26 = vpack.c.bf16 %v270_v24, %v269_v23  ;;  %v35_v27 = vld [vmem:[%s1082_s0 + $0x48] sm:$0xff]  ;;  %v36_v28 = vld [vmem:[%s1082_s0 + $0x50] sm:$0xff]  ;;  %v37_v29 = vld [vmem:[%s1082_s0 + $0x58] sm:$0xff] }
   0x9   :  { %619 = vmatprep.mubr.msk.f32.mxu1 %vm51_vm0, %v28_v5  ;;  %738 = vmatpush3.bf16.msra.mxu1 %v735_v9  ;;  %v38_v30 = vld [vmem:[%s1082_s0 + $0x60] sm:$0xff]  ;;  %v39_v31 = vld [vmem:[%s1082_s0 + $0x68] sm:$0xff]  ;;  %v40_v32 = vld [vmem:[%s1082_s0 + $0x70] sm:$0xff] }
   0xa   :  { %740 = vmatprep.subr.bf16.mxu1 %v739_v12  ;;  %v41_v33 = vld [vmem:[%s1082_s0 + $0x78] sm:$0xff]  ;;  %v271_v34 = vld [vmem:[%s1083_s3 + $0x50] sm:$0xff]  ;;  %v273_v37 = vld [vmem:[%s1083_s3 + $0x60] sm:$0xff] }
   0xb   :  { %v272_v35 = vld [vmem:[%s1083_s3 + $0x58] sm:$0xff]  ;;  %v274_v38 = vld [vmem:[%s1083_s3 + $0x68] sm:$0xff]  ;;  %v275_v40 = vld [vmem:[%s1083_s3 + $0x70] sm:$0xff] }
   0xc   :  { %620 = vmatmul.mubr.msk.f32.gmra.mrb[2].mxu1 %vm51_vm0, %v29_v11  ;;  %v755_v36 = vpack.c.bf16 %v272_v35, %v271_v34  ;;  %v759_v39 = vpack.c.bf16 %v274_v38, %v273_v37  ;;  %v276_v41 = vld [vmem:[%s1083_s3 + $0x78] sm:$0xff]  ;;  %v1025_v43 = vld [vmem:[%s1084_s2] ss:$0 sm:$0xff] }
   0xd   :  { %622 = vmatprep.mubr.msk.f32.mxu1 %vm51_vm0, %v30_v15  ;;  %742 = vmatpush3.bf16.msra.mxu1 %v739_v12  ;;  %v763_v42 = vpack.c.bf16 %v276_v41, %v275_v40 }
   0xe   :  { %744 = vmatprep.subr.bf16.mxu1 %v743_v16 }
  0x10   :  { %623 = vmatmul.mubr.msk.f32.gmra.mrb[4].mxu1 %vm51_vm0, %v31_v17 }
  0x11   :  { %625 = vmatprep.mubr.msk.f32.mxu1 %vm51_vm0, %v32_v20  ;;  %746 = vmatpush3.bf16.msra.mxu1 %v743_v16 }
  0x12   :  { %748 = vmatprep.subr.bf16.mxu1 %v747_v21 }
  0x14   :  { %626 = vmatmul.mubr.msk.f32.gmra.mrb[6].mxu1 %vm51_vm0, %v33_v22 }
  0x15   :  { %628 = vmatprep.mubr.msk.f32.mxu1 %vm51_vm0, %v34_v25  ;;  %750 = vmatpush3.bf16.msra.mxu1 %v747_v21 }
  0x16   :  { %752 = vmatprep.subr.bf16.mxu1 %v751_v26 }
  0x18   :  { %629 = vmatmul.mubr.msk.f32.gmra.mrb[8].mxu1 %vm51_vm0, %v35_v27 }
  0x19   :  { %631 = vmatprep.mubr.msk.f32.mxu1 %vm51_vm0, %v36_v28  ;;  %754 = vmatpush3.bf16.msra.mxu1 %v751_v26  ;;  %v860_v28 = vmov 0.0|0.0  }
  0x1a   :  { %756 = vmatprep.subr.bf16.mxu1 %v755_v36  ;;  %767 = vmatprep.subr.bf16.mxu0 %v860_v28 }
  0x1c   :  { %632 = vmatmul.mubr.msk.f32.gmra.mrb[10].mxu1 %vm51_vm0, %v37_v29  ;;  %v862_v29 = vmov 0.0  }
  0x1d   :  { %634 = vmatprep.mubr.msk.f32.mxu1 %vm51_vm0, %v38_v30  ;;  %758 = vmatpush3.bf16.msra.mxu1 %v755_v36  ;;  %v863_v30 = vmov 0  }
  0x1e   :  { %760 = vmatprep.subr.bf16.mxu1 %v759_v39  ;;  %728 = vmatprep.mubr.msk.f32.mxu0 %vm861_vm1, %v862_v29 }
  0x1f   :  { %795 = vset.pattern.permute.xlu0 %v863_v30 }
  0x20   :  { %635 = vmatmul.mubr.msk.f32.gmra.mrb[12].mxu1 %vm51_vm0, %v39_v31  ;;  %v446_v31 = vld [vmem:[%s1085_s6] sm:$0xff] }
  0x21   :  { %637 = vmatprep.mubr.msk.f32.mxu1 %vm51_vm0, %v40_v32  ;;  %762 = vmatpush3.bf16.msra.mxu1 %v759_v39  ;;  %v1050_v32 = vld [vmem:[%s1086_s4] ss:$0 sm:$0xff] }
  0x22   :  { %764 = vmatprep.subr.bf16.mxu1 %v763_v42  ;;  %449 = vperm.xlu0 %795, %v446_v31  }
  0x24   :  { %638 = vmatmul.mubr.msk.f32.gmra.mrb[14].mxu1 %vm51_vm0, %v41_v33 }
  0x25   :  { %766 = vmatpush3.bf16.msra.mxu1 %v763_v42 }
  0xdb   :  { %v618_v44 = vpop.f32.mrb[0].mxu1 }
  0xdc   :  { %v172_v45 = vadd.f32 %v618_v44, %v1025_v43  ;;  %v166_v46 = vpop.f32.mrb[1].mxu1 }
  0xdd   :  { %v167_v47 = vadd.f32 %v1025_v43, %v166_v46 }
  0xdf   :  { %796 = vtanh.f32 %v167_v47  ;;  %v621_v48 = vpop.f32.mrb[2].mxu1 }
  0xe0   :  { %798 = vtanh.f32 %v172_v45  ;;  %v182_v49 = vadd.f32 %v621_v48, %v1025_v43  ;;  %v176_v50 = vpop.f32.mrb[3].mxu1 }
  0xe1   :  { %v177_v51 = vadd.f32 %v1025_v43, %v176_v50 }
  0xe2   :  { %800 = vtanh.f32 %v182_v49 }
  0xe3   :  { %802 = vtanh.f32 %v177_v51  ;;  %v624_v52 = vpop.f32.mrb[4].mxu1 }
  0xe4   :  { %v192_v53 = vadd.f32 %v624_v52, %v1025_v43  ;;  %v186_v54 = vpop.f32.mrb[5].mxu1 }
  0xe5   :  { %v187_v55 = vadd.f32 %v1025_v43, %v186_v54 }
  0xe6   :  { %804 = vtanh.f32 %v192_v53 }
  0xe7   :  { %806 = vtanh.f32 %v187_v55  ;;  %v627_v56 = vpop.f32.mrb[6].mxu1 }
  0xe8   :  { %v202_v57 = vadd.f32 %v627_v56, %v1025_v43  ;;  %v196_v58 = vpop.f32.mrb[7].mxu1 }
  0xe9   :  { %v797_v59 = vpop.eup %796  ;;  %v197_v60 = vadd.f32 %v1025_v43, %v196_v58 }
  0xea   :  { %v799_v61 = vpop.eup %798  ;;  %672 = vmatprep.mubr.f32.mxu1 %v797_v59  ;;  %808 = vtanh.f32 %v202_v57 }
  0xeb   :  { %673 = vmatmul.mubr.f32.vlgmr.msra.gmra.mrb[16].mxu1 %v799_v61  ;;  %810 = vtanh.f32 %v197_v60  ;;  %v630_v62 = vpop.f32.mrb[8].mxu1 }
  0xec   :  { %v801_v63 = vpop.eup %800  ;;  %v212_v0 = vadd.f32 %v630_v62, %v1025_v43  ;;  %v206_v1 = vpop.f32.mrb[9].mxu1 }
  0xed   :  { %v803_v2 = vpop.eup %802  ;;  %v207_v3 = vadd.f32 %v1025_v43, %v206_v1 }
  0xee   :  { %675 = vmatprep.mubr.f32.mxu1 %v803_v2  ;;  %812 = vtanh.f32 %v212_v0 }
  0xef   :  { %676 = vmatmul.mubr.f32.gmra.mrb[18].mxu1 %v801_v63  ;;  %814 = vtanh.f32 %v207_v3  ;;  %v633_v4 = vpop.f32.mrb[10].mxu1 }
  0xf0   :  { %v805_v5 = vpop.eup %804  ;;  %v222_v6 = vadd.f32 %v633_v4, %v1025_v43  ;;  %v216_v7 = vpop.f32.mrb[11].mxu1 }
  0xf1   :  { %v807_v8 = vpop.eup %806  ;;  %v217_v9 = vadd.f32 %v1025_v43, %v216_v7 }
  0xf2   :  { %678 = vmatprep.mubr.f32.mxu1 %v807_v8  ;;  %816 = vtanh.f32 %v222_v6 }
  0xf3   :  { %679 = vmatmul.mubr.f32.gmra.mrb[20].mxu1 %v805_v5  ;;  %818 = vtanh.f32 %v217_v9  ;;  %v636_v10 = vpop.f32.mrb[12].mxu1 }
  0xf4   :  { %v809_v11 = vpop.eup %808  ;;  %v232_v12 = vadd.f32 %v636_v10, %v1025_v43  ;;  %v226_v13 = vpop.f32.mrb[13].mxu1 }
  0xf5   :  { %v811_v14 = vpop.eup %810  ;;  %v227_v15 = vadd.f32 %v1025_v43, %v226_v13 }
  0xf6   :  { %681 = vmatprep.mubr.f32.mxu1 %v811_v14  ;;  %820 = vtanh.f32 %v232_v12 }
  0xf7   :  { %682 = vmatmul.mubr.f32.gmra.mrb[22].mxu1 %v809_v11  ;;  %822 = vtanh.f32 %v227_v15  ;;  %v639_v16 = vpop.f32.mrb[14].mxu1 }
  0xf8   :  { %v813_v17 = vpop.eup %812  ;;  %v242_v18 = vadd.f32 %v639_v16, %v1025_v43  ;;  %v236_v19 = vpop.f32.mrb[15].mxu1 }
  0xf9   :  { %v815_v20 = vpop.eup %814  ;;  %v237_v21 = vadd.f32 %v1025_v43, %v236_v19 }
  0xfa   :  { %684 = vmatprep.mubr.f32.mxu1 %v815_v20  ;;  %824 = vtanh.f32 %v242_v18 }
  0xfb   :  { %685 = vmatmul.mubr.f32.gmra.mrb[24].mxu1 %v813_v17  ;;  %826 = vtanh.f32 %v237_v21 }
  0xfc   :  { %v817_v22 = vpop.eup %816 }
  0xfd   :  { %v819_v23 = vpop.eup %818 }
  0xfe   :  { %687 = vmatprep.mubr.f32.mxu1 %v819_v23 }
  0xff   :  { %688 = vmatmul.mubr.f32.gmra.mrb[26].mxu1 %v817_v22 }
 0x100   :  { %v821_v24 = vpop.eup %820 }
 0x101   :  { %v823_v25 = vpop.eup %822 }
 0x102   :  { %690 = vmatprep.mubr.f32.mxu1 %v823_v25  ;;  %v445_v25 = vld [vmem:[%s1087_s5] sm:$0xff] }
 0x103   :  { %691 = vmatmul.mubr.f32.gmra.mrb[28].mxu1 %v821_v24 }
 0x104   :  { %v825_v26 = vpop.eup %824 }
 0x105   :  { %v827_v27 = vpop.eup %826 }
 0x106   :  { %693 = vmatprep.mubr.f32.mxu1 %v827_v27 }
 0x107   :  { %694 = vmatmul.mubr.f32.gmra.mrb[30].mxu1 %v825_v26  ;;  %v450_v26 = vpop.permute.xlu0 %449 }
 0x1be   :  { %v674_v33 = vpop.f32.mrb[16].mxu1 }
 0x1bf   :  { %v356_v34 = vadd.f32 %v674_v33, %v1050_v32  ;;  %v350_v35 = vpop.f32.mrb[17].mxu1 }
 0x1c0   :  { %v351_v36 = vadd.f32 %v1050_v32, %v350_v35 }
 0x1c1   :  { %828 = vtanh.f32 %v356_v34 }
 0x1c2   :  { %830 = vtanh.f32 %v351_v36  ;;  %v677_v37 = vpop.f32.mrb[18].mxu1 }
 0x1c3   :  { %v366_v38 = vadd.f32 %v677_v37, %v1050_v32  ;;  %v360_v39 = vpop.f32.mrb[19].mxu1 }
 0x1c4   :  { %v361_v40 = vadd.f32 %v1050_v32, %v360_v39 }
 0x1c5   :  { %832 = vtanh.f32 %v366_v38 }
 0x1c6   :  { %834 = vtanh.f32 %v361_v40  ;;  %v680_v41 = vpop.f32.mrb[20].mxu1 }
 0x1c7   :  { %v376_v42 = vadd.f32 %v680_v41, %v1050_v32  ;;  %v370_v43 = vpop.f32.mrb[21].mxu1 }
 0x1c8   :  { %v371_v44 = vadd.f32 %v1050_v32, %v370_v43 }
 0x1c9   :  { %836 = vtanh.f32 %v376_v42 }
 0x1ca   :  { %838 = vtanh.f32 %v371_v44  ;;  %v683_v45 = vpop.f32.mrb[22].mxu1 }
 0x1cb   :  { %v829_v46 = vpop.eup %828  ;;  %v386_v47 = vadd.f32 %v683_v45, %v1050_v32  ;;  %v380_v48 = vpop.f32.mrb[23].mxu1 }
 0x1cc   :  { %v831_v49 = vpop.eup %830  ;;  %v381_v50 = vadd.f32 %v1050_v32, %v380_v48 }
 0x1cd   :  { %v768_v51 = vpack.c.bf16 %v829_v46, %v831_v49  ;;  %840 = vtanh.f32 %v386_v47 }
 0x1ce   :  { %842 = vtanh.f32 %v381_v50  ;;  %v686_v52 = vpop.f32.mrb[24].mxu1 }
 0x1cf   :  { %v833_v53 = vpop.eup %832  ;;  %769 = vmatpush3.bf16.xpose.msra.mxu0 %v768_v51  ;;  %v396_v54 = vadd.f32 %v686_v52, %v1050_v32  ;;  %v390_v55 = vpop.f32.mrb[25].mxu1 }
 0x1d0   :  { %v835_v56 = vpop.eup %834  ;;  %770 = vmatprep.subr.bf16.mxu0 %v860_v28  ;;  %v391_v57 = vadd.f32 %v1050_v32, %v390_v55 }
 0x1d1   :  { %v771_v58 = vpack.c.bf16 %v833_v53, %v835_v56  ;;  %844 = vtanh.f32 %v396_v54 }
 0x1d2   :  { %846 = vtanh.f32 %v391_v57  ;;  %v689_v59 = vpop.f32.mrb[26].mxu1 }
 0x1d3   :  { %v837_v60 = vpop.eup %836  ;;  %v406_v61 = vadd.f32 %v689_v59, %v1050_v32  ;;  %v400_v62 = vpop.f32.mrb[27].mxu1 }
 0x1d4   :  { %v839_v63 = vpop.eup %838  ;;  %v401_v0 = vadd.f32 %v1050_v32, %v400_v62 }
 0x1d5   :  { %v774_v1 = vpack.c.bf16 %v837_v60, %v839_v63  ;;  %848 = vtanh.f32 %v406_v61 }
 0x1d6   :  { %850 = vtanh.f32 %v401_v0  ;;  %v692_v2 = vpop.f32.mrb[28].mxu1 }
 0x1d7   :  { %v841_v3 = vpop.eup %840  ;;  %772 = vmatpush3.bf16.xpose.msra.mxu0 %v771_v58  ;;  %v416_v4 = vadd.f32 %v692_v2, %v1050_v32  ;;  %v410_v5 = vpop.f32.mrb[29].mxu1 }
 0x1d8   :  { %v843_v6 = vpop.eup %842  ;;  %773 = vmatprep.subr.bf16.mxu0 %v860_v28  ;;  %v411_v7 = vadd.f32 %v1050_v32, %v410_v5 }
 0x1d9   :  { %v777_v8 = vpack.c.bf16 %v841_v3, %v843_v6  ;;  %852 = vtanh.f32 %v416_v4 }
 0x1da   :  { %854 = vtanh.f32 %v411_v7  ;;  %v695_v9 = vpop.f32.mrb[30].mxu1 }
 0x1db   :  { %v845_v10 = vpop.eup %844  ;;  %v426_v11 = vadd.f32 %v695_v9, %v1050_v32  ;;  %v420_v12 = vpop.f32.mrb[31].mxu1 }
 0x1dc   :  { %v847_v13 = vpop.eup %846  ;;  %v421_v14 = vadd.f32 %v1050_v32, %v420_v12 }
 0x1dd   :  { %v780_v15 = vpack.c.bf16 %v845_v10, %v847_v13  ;;  %856 = vtanh.f32 %v426_v11 }
 0x1de   :  { %858 = vtanh.f32 %v421_v14 }
 0x1df   :  { %v849_v16 = vpop.eup %848  ;;  %775 = vmatpush3.bf16.xpose.msra.mxu0 %v774_v1 }
 0x1e0   :  { %v851_v17 = vpop.eup %850  ;;  %776 = vmatprep.subr.bf16.mxu0 %v860_v28 }
 0x1e1   :  { %v783_v18 = vpack.c.bf16 %v849_v16, %v851_v17 }
 0x1e3   :  { %v853_v19 = vpop.eup %852 }
 0x1e4   :  { %v855_v20 = vpop.eup %854 }
 0x1e5   :  { %v786_v21 = vpack.c.bf16 %v853_v19, %v855_v20 }
 0x1e7   :  { %v857_v22 = vpop.eup %856  ;;  %778 = vmatpush3.bf16.xpose.msra.mxu0 %v777_v8 }
 0x1e8   :  { %v859_v23 = vpop.eup %858  ;;  %779 = vmatprep.subr.bf16.mxu0 %v860_v28 }
 0x1e9   :  { %v789_v24 = vpack.c.bf16 %v857_v22, %v859_v23 }
 0x1ef   :  { %781 = vmatpush3.bf16.xpose.msra.mxu0 %v780_v15 }
 0x1f0   :  { %782 = vmatprep.subr.bf16.mxu0 %v860_v28 }
 0x1f7   :  { %784 = vmatpush3.bf16.xpose.msra.mxu0 %v783_v18 }
 0x1f8   :  { %785 = vmatprep.subr.bf16.mxu0 %v860_v28 }
 0x1ff   :  { %787 = vmatpush3.bf16.xpose.msra.mxu0 %v786_v21 }
 0x200   :  { %788 = vmatprep.subr.bf16.mxu0 %v860_v28 }
 0x207   :  { %790 = vmatpush3.bf16.xpose.msra.mxu0 %v789_v24 }
 0x20e   :  { %729 = vmatmul.mubr.f32.vlgmr.msra.gmra.mrb[0].mxu0 %v445_v25 }
 0x2e1   :  { %v518_v27 = vpop.f32.mrb[0].mxu0 }
 0x2e2   :  { %v519_v29 = vadd.f32 %v518_v27, %v450_v26  ;;  %v730_v30 = vpop.f32.mrb[1].mxu0 }
 0x2e4   :  { %522 = vst [vmem:[%s1088_s7] sm:$0xff] %v519_v29 }

</bundles_post_ra>
